<compile_context>
chip_gen: v5e
topology: v5e:2x2
jax: 0.10.0
libtpu: 0.0.40
codegen_flags: <defaults>
</compile_context>

<pallas_src>
from functools import partial

import jax
import jax.numpy as jnp
from jax.experimental import pallas as pl
from jax.experimental.pallas import tpu as pltpu


def _round_up(x, m):
    return (x + m - 1) // m * m


def decoder_kernel(x_ref, umat_ref, w1_ref, w2_ref, y_ref):
    # x_ref    : (Bt, Lh + 2*pad)      VMEM  conv1-padded input rows (length on lanes)
    # umat_ref : (Lh, 2*Lh + 2*pad)    VMEM  fused upsample + conv2-zero-pad matrix (resident)
    # w1_ref   : (C, K)                SMEM  conv1 weights (scalar reads)
    # w2_ref   : (C*C, K)              SMEM  conv2 weights, row = co*C + ci
    # y_ref    : (Bt, C, 2*Lh)         VMEM  output block
    C, K = w1_ref.shape
    Lh = umat_ref.shape[0]
    L2 = y_ref.shape[2]

    xv = x_ref[...]                 # (Bt, Lh + 2*pad) f32
    umat = umat_ref[...]            # (Lh, L2 + 2*pad) f32 (entries are bf16-exact)

    acc = [None] * C                # conv2 accumulators, one (Bt, L2) slab per c_out
    for ci in range(C):
        # ---- conv1 (1 -> ci) + ReLU: K scalar-weight lane-shifted FMAs (VPU) ----
        h = w1_ref[ci, 0] * xv[:, 0:Lh]
        for k in range(1, K):
            h = h + w1_ref[ci, k] * xv[:, k:k + Lh]
        h = jnp.maximum(h, 0.0)                                   # (Bt, Lh)

        # ---- x2 linear upsample + zero-pad margins: one MXU matmul per channel.
        # Split h into bf16-exact hi/lo parts so each MXU pass is exact and the
        # f32 accumulation keeps the result f32-accurate even if the MXU
        # truncates f32 operands to bf16 passes.
        h_hi = h.astype(jnp.bfloat16).astype(jnp.float32)
        h_lo = h - h_hi
        u_ci = (jnp.dot(h_hi, umat, preferred_element_type=jnp.float32) +
                jnp.dot(h_lo, umat, preferred_element_type=jnp.float32))  # (Bt, L2+2*pad)

        # ---- conv2 (ci -> all co): K*C scalar-weight FMAs on lane-dense slabs.
        # (For large C this would switch to a (C_out, C_in) x (C_in, Bt*L2) MXU
        #  matmul; with C=4 scalar FMAs are the right tool.)
        for k in range(K):
            s = u_ci[:, k:k + L2]                                 # (Bt, L2)
            for co in range(C):
                term = w2_ref[co * C + ci, k] * s
                acc[co] = term if acc[co] is None else acc[co] + term

    for co in range(C):
        y_ref[:, co, :] = acc[co].astype(y_ref.dtype)


def _upsample_matrix(Lh, pad, dtype=jnp.float32):
    """(Lh, 2*Lh + 2*pad) matrix: x2 linear interp (align_corners=False) with the
    PyTorch boundary clamps, plus `pad` zero columns on each side so conv2's zero
    padding is baked in.  Nonzero entries are only {0.25, 0.75, 1.0}."""
    L2 = 2 * Lh
    j = jnp.arange(L2, dtype=jnp.float32)
    src = jnp.maximum((j + 0.5) * 0.5 - 0.5, 0.0)
    i0 = jnp.minimum(jnp.floor(src).astype(jnp.int32), Lh - 1)
    i1 = jnp.minimum(i0 + 1, Lh - 1)
    frac = src - i0.astype(jnp.float32)
    rows = jnp.arange(Lh, dtype=jnp.int32)[:, None]
    core = ((rows == i0[None, :]).astype(dtype) * (1.0 - frac)[None, :] +
            (rows == i1[None, :]).astype(dtype) * frac[None, :])
    return jnp.pad(core, ((0, 0), (pad, pad)))


@partial(jax.jit, static_argnames=("block_b",))
def decoder_forward(x, w1_oik, w2_oik, *, block_b=None):
    """x: (B, Lh) f32; w1_oik: (C, 1, K); w2_oik: (C, C, K). Returns (B, C, 2*Lh)."""
    B, Lh = x.shape
    C, in_c, K = w1_oik.shape
    assert in_c == 1, f"conv1 must have 1 input channel, got {in_c}"
    assert K % 2 == 1, f"kernel size must be odd, got {K}"
    pad = K // 2
    L2 = 2 * Lh
    Lx = Lh + 2 * pad
    Lu = L2 + 2 * pad

    # ---- batch-block sizing from a VMEM budget (multiple of 8 sublanes) ----
    if block_b is None:
        umat_bytes = 4 * Lh * Lu
        per_row = 4 * (2 * Lx + 2 * Lu + 4 * C * L2)  # in blk(2-buf) + u slab + acc + out blk(2-buf)
        budget = 8 * 1024 * 1024                      # stay well inside 16-32 MiB scoped VMEM
        avail = max(budget - umat_bytes, budget // 8)
        block_b = max(8, min(256, (avail // max(per_row, 1)) // 8 * 8))
    B8 = _round_up(max(B, 1), 8)
    block_b = min(block_b, B8)
    # keep >= 2 grid steps when the batch allows it (v7x: 2 TensorCores on "parallel")
    if B8 // block_b < 2 and B8 >= 16:
        block_b = _round_up(B8 // 2, 8)
    B_pad = _round_up(B8, block_b)
    grid = (B_pad // block_b,)

    # ---- host glue: pad batch to the block multiple and length by conv1's pad ----
    x_p = jnp.pad(x.astype(jnp.float32), ((0, B_pad - B), (pad, pad)))     # (B_pad, Lx)
    u_mat = _upsample_matrix(Lh, pad)                                      # (Lh, Lu)
    w1_s = w1_oik[:, 0, :].astype(jnp.float32)                             # (C, K)
    w2_s = w2_oik.reshape(C * C, K).astype(jnp.float32)                    # row = co*C + ci

    y = pl.pallas_call(
        decoder_kernel,
        out_shape=jax.ShapeDtypeStruct((B_pad, C, L2), x.dtype),
        grid=grid,
        in_specs=[
            pl.BlockSpec((block_b, Lx), lambda b: (b, 0)),                 # input block
            pl.BlockSpec((Lh, Lu), lambda b: (0, 0)),                      # resident upsample matrix
            pl.BlockSpec(memory_space=pltpu.MemorySpace.SMEM),             # conv1 weights (scalars)
            pl.BlockSpec(memory_space=pltpu.MemorySpace.SMEM),             # conv2 weights (scalars)
        ],
        out_specs=pl.BlockSpec((block_b, C, L2), lambda b: (b, 0, 0)),
        compiler_params=pltpu.CompilerParams(
            dimension_semantics=("parallel",),
            vmem_limit_bytes=32 * 1024 * 1024),
    )(x_p, u_mat, w1_s, w2_s)

    return y if B == B_pad else y[:B]


def decoder_ref(x, w1_oik, w2_oik):
    """Pure-JAX reference of the PyTorch Decoder.forward."""
    C, _, K = w1_oik.shape
    pad = K // 2
    B, Lh = x.shape
    x3 = x[:, None, :]                                              # (B, 1, Lh)
    h = jax.lax.conv_general_dilated(
        x3, w1_oik, (1,), [(pad, pad)], dimension_numbers=('NCH', 'OIH', 'NCH'))
    h = jnp.maximum(h, 0.0)
    # linear interpolation, scale_factor=2, align_corners=False
    L2 = 2 * Lh
    j = jnp.arange(L2)
    src = jnp.maximum((j.astype(jnp.float32) + 0.5) * 0.5 - 0.5, 0.0)
    i0 = jnp.minimum(jnp.floor(src).astype(jnp.int32), Lh - 1)
    i1 = jnp.minimum(i0 + 1, Lh - 1)
    frac = src - i0.astype(jnp.float32)
    u = h[..., i0] * (1.0 - frac) + h[..., i1] * frac               # (B, C, 2*Lh)
    y = jax.lax.conv_general_dilated(
        u, w2_oik, (1,), [(pad, pad)], dimension_numbers=('NCH', 'OIH', 'NCH'))
    return y


if __name__ == "__main__":
    key = jax.random.PRNGKey(0)
    kx, k1, k2 = jax.random.split(key, 3)

    B, Lh = 2, 16          # batch, seq_len_half
    C, K = 4, 3            # n_channels, kernel_size (odd)

    x = jax.random.normal(kx, (B, Lh), jnp.float32)
    # Deterministic weight init (PyTorch-default-like uniform bounds), bias=False.
    b1 = 1.0 / (1 * K) ** 0.5
    b2 = 1.0 / (C * K) ** 0.5
    w1 = jax.random.uniform(k1, (C, 1, K), jnp.float32, -b1, b1)   # conv1.weight
    w2 = jax.random.uniform(k2, (C, C, K), jnp.float32, -b2, b2)   # conv2.weight

    y = jax.block_until_ready(decoder_forward(x, w1, w2))
    y_ref = decoder_ref(x, w1, w2)

    assert y.shape == (B, C, 2 * Lh), y.shape
    err = float(jnp.max(jnp.abs(y - y_ref)))
    # 1e-4 covers the worst-case bf16 hi/lo-split residual of the MXU upsample
    # passes; with native f32 matmul passes the observed error is ~1e-6.
    assert err < 1e-4, f"max abs err = {err}"
    print("KERNEL_OK")
</pallas_src>

<mosaic_0001>
module attributes {stable_mosaic.version = 11 : i64} {
  func.func @decoder_kernel(%arg0: i32, %arg1: memref<8x18xf32, #tpu.memory_space<vmem>>, %arg2: memref<16x34xf32, #tpu.memory_space<vmem>>, %arg3: memref<4x3xf32, #tpu.memory_space<smem>>, %arg4: memref<16x3xf32, #tpu.memory_space<smem>>, %arg5: memref<8x4x32xf32, #tpu.memory_space<vmem>>) attributes {dimension_semantics = [#tpu.dimension_semantics<parallel>], iteration_bounds = array<i64: 1>, scalar_prefetch = 0 : i64, scratch_operands = 0 : i64, tpu.core_type = #tpu.core_type<tc>, window_params = [{transform_indices = @transform_0, window_bounds = array<i64: 8, 18>}, {pipeline_mode = #tpu.pipeline_mode<synchronous>, transform_indices = @transform_1, window_bounds = array<i64: 16, 34>}, {transform_indices = @transform_2, window_bounds = array<i64: 4, 3>}, {transform_indices = @transform_3, window_bounds = array<i64: 16, 3>}, {transform_indices = @transform_4, window_bounds = array<i64: 8, 4, 32>}]} {
    %c0 = arith.constant 0 : index
    %c0_0 = arith.constant 0 : index
    %0 = vector.load %arg1[%c0, %c0_0] : memref<8x18xf32, #tpu.memory_space<vmem>>, vector<8x18xf32>
    %c0_1 = arith.constant 0 : index
    %c0_2 = arith.constant 0 : index
    %1 = vector.load %arg2[%c0_1, %c0_2] : memref<16x34xf32, #tpu.memory_space<vmem>>, vector<16x34xf32>
    %c0_3 = arith.constant 0 : index
    %c0_4 = arith.constant 0 : index
    %2 = memref.load %arg3[%c0_3, %c0_4] : memref<4x3xf32, #tpu.memory_space<smem>>
    %3 = vector.extract_strided_slice %0 {offsets = [0, 0], sizes = [8, 16], strides = [1, 1]} : vector<8x18xf32> to vector<8x16xf32>
    %4 = vector.broadcast %2 : f32 to vector<8x16xf32>
    %5 = arith.mulf %4, %3 : vector<8x16xf32>
    %c0_5 = arith.constant 0 : index
    %c1 = arith.constant 1 : index
    %6 = memref.load %arg3[%c0_5, %c1] : memref<4x3xf32, #tpu.memory_space<smem>>
    %7 = vector.extract_strided_slice %0 {offsets = [0, 1], sizes = [8, 16], strides = [1, 1]} : vector<8x18xf32> to vector<8x16xf32>
    %8 = vector.broadcast %6 : f32 to vector<8x16xf32>
    %9 = arith.mulf %8, %7 : vector<8x16xf32>
    %10 = arith.addf %5, %9 : vector<8x16xf32>
    %c0_6 = arith.constant 0 : index
    %c2 = arith.constant 2 : index
    %11 = memref.load %arg3[%c0_6, %c2] : memref<4x3xf32, #tpu.memory_space<smem>>
    %12 = vector.extract_strided_slice %0 {offsets = [0, 2], sizes = [8, 16], strides = [1, 1]} : vector<8x18xf32> to vector<8x16xf32>
    %13 = vector.broadcast %11 : f32 to vector<8x16xf32>
    %14 = arith.mulf %13, %12 : vector<8x16xf32>
    %15 = arith.addf %10, %14 : vector<8x16xf32>
    %cst = arith.constant 0.000000e+00 : f32
    %16 = vector.broadcast %cst : f32 to vector<8x16xf32>
    %17 = arith.maximumf %15, %16 : vector<8x16xf32>
    %18 = arith.truncf %17 : vector<8x16xf32> to vector<8x16xbf16>
    %19 = arith.extf %18 : vector<8x16xbf16> to vector<8x16xf32>
    %20 = arith.subf %17, %19 : vector<8x16xf32>
    %cst_7 = arith.constant dense<0.000000e+00> : vector<8x34xf32>
    %21 = tpu.matmul %19, %1, %cst_7 {dimension_numbers = #tpu.dot_dimension_numbers<[1], [0], [0], [1], [0, 0, 1, 1], [], []>} : vector<8x16xf32>, vector<16x34xf32>, vector<8x34xf32> -> vector<8x34xf32>
    %cst_8 = arith.constant dense<0.000000e+00> : vector<8x34xf32>
    %22 = tpu.matmul %20, %1, %cst_8 {dimension_numbers = #tpu.dot_dimension_numbers<[1], [0], [0], [1], [0, 0, 1, 1], [], []>} : vector<8x16xf32>, vector<16x34xf32>, vector<8x34xf32> -> vector<8x34xf32>
    %23 = arith.addf %21, %22 : vector<8x34xf32>
    %24 = vector.extract_strided_slice %23 {offsets = [0, 0], sizes = [8, 32], strides = [1, 1]} : vector<8x34xf32> to vector<8x32xf32>
    %c0_9 = arith.constant 0 : index
    %c0_10 = arith.constant 0 : index
    %25 = memref.load %arg4[%c0_9, %c0_10] : memref<16x3xf32, #tpu.memory_space<smem>>
    %26 = vector.broadcast %25 : f32 to vector<8x32xf32>
    %27 = arith.mulf %26, %24 : vector<8x32xf32>
    %c4 = arith.constant 4 : index
    %c0_11 = arith.constant 0 : index
    %28 = memref.load %arg4[%c4, %c0_11] : memref<16x3xf32, #tpu.memory_space<smem>>
    %29 = vector.broadcast %28 : f32 to vector<8x32xf32>
    %30 = arith.mulf %29, %24 : vector<8x32xf32>
    %c8 = arith.constant 8 : index
    %c0_12 = arith.constant 0 : index
    %31 = memref.load %arg4[%c8, %c0_12] : memref<16x3xf32, #tpu.memory_space<smem>>
    %32 = vector.broadcast %31 : f32 to vector<8x32xf32>
    %33 = arith.mulf %32, %24 : vector<8x32xf32>
    %c12 = arith.constant 12 : index
    %c0_13 = arith.constant 0 : index
    %34 = memref.load %arg4[%c12, %c0_13] : memref<16x3xf32, #tpu.memory_space<smem>>
    %35 = vector.broadcast %34 : f32 to vector<8x32xf32>
    %36 = arith.mulf %35, %24 : vector<8x32xf32>
    %37 = vector.extract_strided_slice %23 {offsets = [0, 1], sizes = [8, 32], strides = [1, 1]} : vector<8x34xf32> to vector<8x32xf32>
    %c0_14 = arith.constant 0 : index
    %c1_15 = arith.constant 1 : index
    %38 = memref.load %arg4[%c0_14, %c1_15] : memref<16x3xf32, #tpu.memory_space<smem>>
    %39 = vector.broadcast %38 : f32 to vector<8x32xf32>
    %40 = arith.mulf %39, %37 : vector<8x32xf32>
    %41 = arith.addf %27, %40 : vector<8x32xf32>
    %c4_16 = arith.constant 4 : index
    %c1_17 = arith.constant 1 : index
    %42 = memref.load %arg4[%c4_16, %c1_17] : memref<16x3xf32, #tpu.memory_space<smem>>
    %43 = vector.broadcast %42 : f32 to vector<8x32xf32>
    %44 = arith.mulf %43, %37 : vector<8x32xf32>
    %45 = arith.addf %30, %44 : vector<8x32xf32>
    %c8_18 = arith.constant 8 : index
    %c1_19 = arith.constant 1 : index
    %46 = memref.load %arg4[%c8_18, %c1_19] : memref<16x3xf32, #tpu.memory_space<smem>>
    %47 = vector.broadcast %46 : f32 to vector<8x32xf32>
    %48 = arith.mulf %47, %37 : vector<8x32xf32>
    %49 = arith.addf %33, %48 : vector<8x32xf32>
    %c12_20 = arith.constant 12 : index
    %c1_21 = arith.constant 1 : index
    %50 = memref.load %arg4[%c12_20, %c1_21] : memref<16x3xf32, #tpu.memory_space<smem>>
    %51 = vector.broadcast %50 : f32 to vector<8x32xf32>
    %52 = arith.mulf %51, %37 : vector<8x32xf32>
    %53 = arith.addf %36, %52 : vector<8x32xf32>
    %54 = vector.extract_strided_slice %23 {offsets = [0, 2], sizes = [8, 32], strides = [1, 1]} : vector<8x34xf32> to vector<8x32xf32>
    %c0_22 = arith.constant 0 : index
    %c2_23 = arith.constant 2 : index
    %55 = memref.load %arg4[%c0_22, %c2_23] : memref<16x3xf32, #tpu.memory_space<smem>>
    %56 = vector.broadcast %55 : f32 to vector<8x32xf32>
    %57 = arith.mulf %56, %54 : vector<8x32xf32>
    %58 = arith.addf %41, %57 : vector<8x32xf32>
    %c4_24 = arith.constant 4 : index
    %c2_25 = arith.constant 2 : index
    %59 = memref.load %arg4[%c4_24, %c2_25] : memref<16x3xf32, #tpu.memory_space<smem>>
    %60 = vector.broadcast %59 : f32 to vector<8x32xf32>
    %61 = arith.mulf %60, %54 : vector<8x32xf32>
    %62 = arith.addf %45, %61 : vector<8x32xf32>
    %c8_26 = arith.constant 8 : index
    %c2_27 = arith.constant 2 : index
    %63 = memref.load %arg4[%c8_26, %c2_27] : memref<16x3xf32, #tpu.memory_space<smem>>
    %64 = vector.broadcast %63 : f32 to vector<8x32xf32>
    %65 = arith.mulf %64, %54 : vector<8x32xf32>
    %66 = arith.addf %49, %65 : vector<8x32xf32>
    %c12_28 = arith.constant 12 : index
    %c2_29 = arith.constant 2 : index
    %67 = memref.load %arg4[%c12_28, %c2_29] : memref<16x3xf32, #tpu.memory_space<smem>>
    %68 = vector.broadcast %67 : f32 to vector<8x32xf32>
    %69 = arith.mulf %68, %54 : vector<8x32xf32>
    %70 = arith.addf %53, %69 : vector<8x32xf32>
    %c1_30 = arith.constant 1 : index
    %c0_31 = arith.constant 0 : index
    %71 = memref.load %arg3[%c1_30, %c0_31] : memref<4x3xf32, #tpu.memory_space<smem>>
    %72 = vector.extract_strided_slice %0 {offsets = [0, 0], sizes = [8, 16], strides = [1, 1]} : vector<8x18xf32> to vector<8x16xf32>
    %73 = vector.broadcast %71 : f32 to vector<8x16xf32>
    %74 = arith.mulf %73, %72 : vector<8x16xf32>
    %c1_32 = arith.constant 1 : index
    %c1_33 = arith.constant 1 : index
    %75 = memref.load %arg3[%c1_32, %c1_33] : memref<4x3xf32, #tpu.memory_space<smem>>
    %76 = vector.extract_strided_slice %0 {offsets = [0, 1], sizes = [8, 16], strides = [1, 1]} : vector<8x18xf32> to vector<8x16xf32>
    %77 = vector.broadcast %75 : f32 to vector<8x16xf32>
    %78 = arith.mulf %77, %76 : vector<8x16xf32>
    %79 = arith.addf %74, %78 : vector<8x16xf32>
    %c1_34 = arith.constant 1 : index
    %c2_35 = arith.constant 2 : index
    %80 = memref.load %arg3[%c1_34, %c2_35] : memref<4x3xf32, #tpu.memory_space<smem>>
    %81 = vector.extract_strided_slice %0 {offsets = [0, 2], sizes = [8, 16], strides = [1, 1]} : vector<8x18xf32> to vector<8x16xf32>
    %82 = vector.broadcast %80 : f32 to vector<8x16xf32>
    %83 = arith.mulf %82, %81 : vector<8x16xf32>
    %84 = arith.addf %79, %83 : vector<8x16xf32>
    %cst_36 = arith.constant 0.000000e+00 : f32
    %85 = vector.broadcast %cst_36 : f32 to vector<8x16xf32>
    %86 = arith.maximumf %84, %85 : vector<8x16xf32>
    %87 = arith.truncf %86 : vector<8x16xf32> to vector<8x16xbf16>
    %88 = arith.extf %87 : vector<8x16xbf16> to vector<8x16xf32>
    %89 = arith.subf %86, %88 : vector<8x16xf32>
    %cst_37 = arith.constant dense<0.000000e+00> : vector<8x34xf32>
    %90 = tpu.matmul %88, %1, %cst_37 {dimension_numbers = #tpu.dot_dimension_numbers<[1], [0], [0], [1], [0, 0, 1, 1], [], []>} : vector<8x16xf32>, vector<16x34xf32>, vector<8x34xf32> -> vector<8x34xf32>
    %cst_38 = arith.constant dense<0.000000e+00> : vector<8x34xf32>
    %91 = tpu.matmul %89, %1, %cst_38 {dimension_numbers = #tpu.dot_dimension_numbers<[1], [0], [0], [1], [0, 0, 1, 1], [], []>} : vector<8x16xf32>, vector<16x34xf32>, vector<8x34xf32> -> vector<8x34xf32>
    %92 = arith.addf %90, %91 : vector<8x34xf32>
    %93 = vector.extract_strided_slice %92 {offsets = [0, 0], sizes = [8, 32], strides = [1, 1]} : vector<8x34xf32> to vector<8x32xf32>
    %c1_39 = arith.constant 1 : index
    %c0_40 = arith.constant 0 : index
    %94 = memref.load %arg4[%c1_39, %c0_40] : memref<16x3xf32, #tpu.memory_space<smem>>
    %95 = vector.broadcast %94 : f32 to vector<8x32xf32>
    %96 = arith.mulf %95, %93 : vector<8x32xf32>
    %97 = arith.addf %58, %96 : vector<8x32xf32>
    %c5 = arith.constant 5 : index
    %c0_41 = arith.constant 0 : index
    %98 = memref.load %arg4[%c5, %c0_41] : memref<16x3xf32, #tpu.memory_space<smem>>
    %99 = vector.broadcast %98 : f32 to vector<8x32xf32>
    %100 = arith.mulf %99, %93 : vector<8x32xf32>
    %101 = arith.addf %62, %100 : vector<8x32xf32>
    %c9 = arith.constant 9 : index
    %c0_42 = arith.constant 0 : index
    %102 = memref.load %arg4[%c9, %c0_42] : memref<16x3xf32, #tpu.memory_space<smem>>
    %103 = vector.broadcast %102 : f32 to vector<8x32xf32>
    %104 = arith.mulf %103, %93 : vector<8x32xf32>
    %105 = arith.addf %66, %104 : vector<8x32xf32>
    %c13 = arith.constant 13 : index
    %c0_43 = arith.constant 0 : index
    %106 = memref.load %arg4[%c13, %c0_43] : memref<16x3xf32, #tpu.memory_space<smem>>
    %107 = vector.broadcast %106 : f32 to vector<8x32xf32>
    %108 = arith.mulf %107, %93 : vector<8x32xf32>
    %109 = arith.addf %70, %108 : vector<8x32xf32>
    %110 = vector.extract_strided_slice %92 {offsets = [0, 1], sizes = [8, 32], strides = [1, 1]} : vector<8x34xf32> to vector<8x32xf32>
    %c1_44 = arith.constant 1 : index
    %c1_45 = arith.constant 1 : index
    %111 = memref.load %arg4[%c1_44, %c1_45] : memref<16x3xf32, #tpu.memory_space<smem>>
    %112 = vector.broadcast %111 : f32 to vector<8x32xf32>
    %113 = arith.mulf %112, %110 : vector<8x32xf32>
    %114 = arith.addf %97, %113 : vector<8x32xf32>
    %c5_46 = arith.constant 5 : index
    %c1_47 = arith.constant 1 : index
    %115 = memref.load %arg4[%c5_46, %c1_47] : memref<16x3xf32, #tpu.memory_space<smem>>
    %116 = vector.broadcast %115 : f32 to vector<8x32xf32>
    %117 = arith.mulf %116, %110 : vector<8x32xf32>
    %118 = arith.addf %101, %117 : vector<8x32xf32>
    %c9_48 = arith.constant 9 : index
    %c1_49 = arith.constant 1 : index
    %119 = memref.load %arg4[%c9_48, %c1_49] : memref<16x3xf32, #tpu.memory_space<smem>>
    %120 = vector.broadcast %119 : f32 to vector<8x32xf32>
    %121 = arith.mulf %120, %110 : vector<8x32xf32>
    %122 = arith.addf %105, %121 : vector<8x32xf32>
    %c13_50 = arith.constant 13 : index
    %c1_51 = arith.constant 1 : index
    %123 = memref.load %arg4[%c13_50, %c1_51] : memref<16x3xf32, #tpu.memory_space<smem>>
    %124 = vector.broadcast %123 : f32 to vector<8x32xf32>
    %125 = arith.mulf %124, %110 : vector<8x32xf32>
    %126 = arith.addf %109, %125 : vector<8x32xf32>
    %127 = vector.extract_strided_slice %92 {offsets = [0, 2], sizes = [8, 32], strides = [1, 1]} : vector<8x34xf32> to vector<8x32xf32>
    %c1_52 = arith.constant 1 : index
    %c2_53 = arith.constant 2 : index
    %128 = memref.load %arg4[%c1_52, %c2_53] : memref<16x3xf32, #tpu.memory_space<smem>>
    %129 = vector.broadcast %128 : f32 to vector<8x32xf32>
    %130 = arith.mulf %129, %127 : vector<8x32xf32>
    %131 = arith.addf %114, %130 : vector<8x32xf32>
    %c5_54 = arith.constant 5 : index
    %c2_55 = arith.constant 2 : index
    %132 = memref.load %arg4[%c5_54, %c2_55] : memref<16x3xf32, #tpu.memory_space<smem>>
    %133 = vector.broadcast %132 : f32 to vector<8x32xf32>
    %134 = arith.mulf %133, %127 : vector<8x32xf32>
    %135 = arith.addf %118, %134 : vector<8x32xf32>
    %c9_56 = arith.constant 9 : index
    %c2_57 = arith.constant 2 : index
    %136 = memref.load %arg4[%c9_56, %c2_57] : memref<16x3xf32, #tpu.memory_space<smem>>
    %137 = vector.broadcast %136 : f32 to vector<8x32xf32>
    %138 = arith.mulf %137, %127 : vector<8x32xf32>
    %139 = arith.addf %122, %138 : vector<8x32xf32>
    %c13_58 = arith.constant 13 : index
    %c2_59 = arith.constant 2 : index
    %140 = memref.load %arg4[%c13_58, %c2_59] : memref<16x3xf32, #tpu.memory_space<smem>>
    %141 = vector.broadcast %140 : f32 to vector<8x32xf32>
    %142 = arith.mulf %141, %127 : vector<8x32xf32>
    %143 = arith.addf %126, %142 : vector<8x32xf32>
    %c2_60 = arith.constant 2 : index
    %c0_61 = arith.constant 0 : index
    %144 = memref.load %arg3[%c2_60, %c0_61] : memref<4x3xf32, #tpu.memory_space<smem>>
    %145 = vector.extract_strided_slice %0 {offsets = [0, 0], sizes = [8, 16], strides = [1, 1]} : vector<8x18xf32> to vector<8x16xf32>
    %146 = vector.broadcast %144 : f32 to vector<8x16xf32>
    %147 = arith.mulf %146, %145 : vector<8x16xf32>
    %c2_62 = arith.constant 2 : index
    %c1_63 = arith.constant 1 : index
    %148 = memref.load %arg3[%c2_62, %c1_63] : memref<4x3xf32, #tpu.memory_space<smem>>
    %149 = vector.extract_strided_slice %0 {offsets = [0, 1], sizes = [8, 16], strides = [1, 1]} : vector<8x18xf32> to vector<8x16xf32>
    %150 = vector.broadcast %148 : f32 to vector<8x16xf32>
    %151 = arith.mulf %150, %149 : vector<8x16xf32>
    %152 = arith.addf %147, %151 : vector<8x16xf32>
    %c2_64 = arith.constant 2 : index
    %c2_65 = arith.constant 2 : index
    %153 = memref.load %arg3[%c2_64, %c2_65] : memref<4x3xf32, #tpu.memory_space<smem>>
    %154 = vector.extract_strided_slice %0 {offsets = [0, 2], sizes = [8, 16], strides = [1, 1]} : vector<8x18xf32> to vector<8x16xf32>
    %155 = vector.broadcast %153 : f32 to vector<8x16xf32>
    %156 = arith.mulf %155, %154 : vector<8x16xf32>
    %157 = arith.addf %152, %156 : vector<8x16xf32>
    %cst_66 = arith.constant 0.000000e+00 : f32
    %158 = vector.broadcast %cst_66 : f32 to vector<8x16xf32>
    %159 = arith.maximumf %157, %158 : vector<8x16xf32>
    %160 = arith.truncf %159 : vector<8x16xf32> to vector<8x16xbf16>
    %161 = arith.extf %160 : vector<8x16xbf16> to vector<8x16xf32>
    %162 = arith.subf %159, %161 : vector<8x16xf32>
    %cst_67 = arith.constant dense<0.000000e+00> : vector<8x34xf32>
    %163 = tpu.matmul %161, %1, %cst_67 {dimension_numbers = #tpu.dot_dimension_numbers<[1], [0], [0], [1], [0, 0, 1, 1], [], []>} : vector<8x16xf32>, vector<16x34xf32>, vector<8x34xf32> -> vector<8x34xf32>
    %cst_68 = arith.constant dense<0.000000e+00> : vector<8x34xf32>
    %164 = tpu.matmul %162, %1, %cst_68 {dimension_numbers = #tpu.dot_dimension_numbers<[1], [0], [0], [1], [0, 0, 1, 1], [], []>} : vector<8x16xf32>, vector<16x34xf32>, vector<8x34xf32> -> vector<8x34xf32>
    %165 = arith.addf %163, %164 : vector<8x34xf32>
    %166 = vector.extract_strided_slice %165 {offsets = [0, 0], sizes = [8, 32], strides = [1, 1]} : vector<8x34xf32> to vector<8x32xf32>
    %c2_69 = arith.constant 2 : index
    %c0_70 = arith.constant 0 : index
    %167 = memref.load %arg4[%c2_69, %c0_70] : memref<16x3xf32, #tpu.memory_space<smem>>
    %168 = vector.broadcast %167 : f32 to vector<8x32xf32>
    %169 = arith.mulf %168, %166 : vector<8x32xf32>
    %170 = arith.addf %131, %169 : vector<8x32xf32>
    %c6 = arith.constant 6 : index
    %c0_71 = arith.constant 0 : index
    %171 = memref.load %arg4[%c6, %c0_71] : memref<16x3xf32, #tpu.memory_space<smem>>
    %172 = vector.broadcast %171 : f32 to vector<8x32xf32>
    %173 = arith.mulf %172, %166 : vector<8x32xf32>
    %174 = arith.addf %135, %173 : vector<8x32xf32>
    %c10 = arith.constant 10 : index
    %c0_72 = arith.constant 0 : index
    %175 = memref.load %arg4[%c10, %c0_72] : memref<16x3xf32, #tpu.memory_space<smem>>
    %176 = vector.broadcast %175 : f32 to vector<8x32xf32>
    %177 = arith.mulf %176, %166 : vector<8x32xf32>
    %178 = arith.addf %139, %177 : vector<8x32xf32>
    %c14 = arith.constant 14 : index
    %c0_73 = arith.constant 0 : index
    %179 = memref.load %arg4[%c14, %c0_73] : memref<16x3xf32, #tpu.memory_space<smem>>
    %180 = vector.broadcast %179 : f32 to vector<8x32xf32>
    %181 = arith.mulf %180, %166 : vector<8x32xf32>
    %182 = arith.addf %143, %181 : vector<8x32xf32>
    %183 = vector.extract_strided_slice %165 {offsets = [0, 1], sizes = [8, 32], strides = [1, 1]} : vector<8x34xf32> to vector<8x32xf32>
    %c2_74 = arith.constant 2 : index
    %c1_75 = arith.constant 1 : index
    %184 = memref.load %arg4[%c2_74, %c1_75] : memref<16x3xf32, #tpu.memory_space<smem>>
    %185 = vector.broadcast %184 : f32 to vector<8x32xf32>
    %186 = arith.mulf %185, %183 : vector<8x32xf32>
    %187 = arith.addf %170, %186 : vector<8x32xf32>
    %c6_76 = arith.constant 6 : index
    %c1_77 = arith.constant 1 : index
    %188 = memref.load %arg4[%c6_76, %c1_77] : memref<16x3xf32, #tpu.memory_space<smem>>
    %189 = vector.broadcast %188 : f32 to vector<8x32xf32>
    %190 = arith.mulf %189, %183 : vector<8x32xf32>
    %191 = arith.addf %174, %190 : vector<8x32xf32>
    %c10_78 = arith.constant 10 : index
    %c1_79 = arith.constant 1 : index
    %192 = memref.load %arg4[%c10_78, %c1_79] : memref<16x3xf32, #tpu.memory_space<smem>>
    %193 = vector.broadcast %192 : f32 to vector<8x32xf32>
    %194 = arith.mulf %193, %183 : vector<8x32xf32>
    %195 = arith.addf %178, %194 : vector<8x32xf32>
    %c14_80 = arith.constant 14 : index
    %c1_81 = arith.constant 1 : index
    %196 = memref.load %arg4[%c14_80, %c1_81] : memref<16x3xf32, #tpu.memory_space<smem>>
    %197 = vector.broadcast %196 : f32 to vector<8x32xf32>
    %198 = arith.mulf %197, %183 : vector<8x32xf32>
    %199 = arith.addf %182, %198 : vector<8x32xf32>
    %200 = vector.extract_strided_slice %165 {offsets = [0, 2], sizes = [8, 32], strides = [1, 1]} : vector<8x34xf32> to vector<8x32xf32>
    %c2_82 = arith.constant 2 : index
    %c2_83 = arith.constant 2 : index
    %201 = memref.load %arg4[%c2_82, %c2_83] : memref<16x3xf32, #tpu.memory_space<smem>>
    %202 = vector.broadcast %201 : f32 to vector<8x32xf32>
    %203 = arith.mulf %202, %200 : vector<8x32xf32>
    %204 = arith.addf %187, %203 : vector<8x32xf32>
    %c6_84 = arith.constant 6 : index
    %c2_85 = arith.constant 2 : index
    %205 = memref.load %arg4[%c6_84, %c2_85] : memref<16x3xf32, #tpu.memory_space<smem>>
    %206 = vector.broadcast %205 : f32 to vector<8x32xf32>
    %207 = arith.mulf %206, %200 : vector<8x32xf32>
    %208 = arith.addf %191, %207 : vector<8x32xf32>
    %c10_86 = arith.constant 10 : index
    %c2_87 = arith.constant 2 : index
    %209 = memref.load %arg4[%c10_86, %c2_87] : memref<16x3xf32, #tpu.memory_space<smem>>
    %210 = vector.broadcast %209 : f32 to vector<8x32xf32>
    %211 = arith.mulf %210, %200 : vector<8x32xf32>
    %212 = arith.addf %195, %211 : vector<8x32xf32>
    %c14_88 = arith.constant 14 : index
    %c2_89 = arith.constant 2 : index
    %213 = memref.load %arg4[%c14_88, %c2_89] : memref<16x3xf32, #tpu.memory_space<smem>>
    %214 = vector.broadcast %213 : f32 to vector<8x32xf32>
    %215 = arith.mulf %214, %200 : vector<8x32xf32>
    %216 = arith.addf %199, %215 : vector<8x32xf32>
    %c3 = arith.constant 3 : index
    %c0_90 = arith.constant 0 : index
    %217 = memref.load %arg3[%c3, %c0_90] : memref<4x3xf32, #tpu.memory_space<smem>>
    %218 = vector.extract_strided_slice %0 {offsets = [0, 0], sizes = [8, 16], strides = [1, 1]} : vector<8x18xf32> to vector<8x16xf32>
    %219 = vector.broadcast %217 : f32 to vector<8x16xf32>
    %220 = arith.mulf %219, %218 : vector<8x16xf32>
    %c3_91 = arith.constant 3 : index
    %c1_92 = arith.constant 1 : index
    %221 = memref.load %arg3[%c3_91, %c1_92] : memref<4x3xf32, #tpu.memory_space<smem>>
    %222 = vector.extract_strided_slice %0 {offsets = [0, 1], sizes = [8, 16], strides = [1, 1]} : vector<8x18xf32> to vector<8x16xf32>
    %223 = vector.broadcast %221 : f32 to vector<8x16xf32>
    %224 = arith.mulf %223, %222 : vector<8x16xf32>
    %225 = arith.addf %220, %224 : vector<8x16xf32>
    %c3_93 = arith.constant 3 : index
    %c2_94 = arith.constant 2 : index
    %226 = memref.load %arg3[%c3_93, %c2_94] : memref<4x3xf32, #tpu.memory_space<smem>>
    %227 = vector.extract_strided_slice %0 {offsets = [0, 2], sizes = [8, 16], strides = [1, 1]} : vector<8x18xf32> to vector<8x16xf32>
    %228 = vector.broadcast %226 : f32 to vector<8x16xf32>
    %229 = arith.mulf %228, %227 : vector<8x16xf32>
    %230 = arith.addf %225, %229 : vector<8x16xf32>
    %cst_95 = arith.constant 0.000000e+00 : f32
    %231 = vector.broadcast %cst_95 : f32 to vector<8x16xf32>
    %232 = arith.maximumf %230, %231 : vector<8x16xf32>
    %233 = arith.truncf %232 : vector<8x16xf32> to vector<8x16xbf16>
    %234 = arith.extf %233 : vector<8x16xbf16> to vector<8x16xf32>
    %235 = arith.subf %232, %234 : vector<8x16xf32>
    %cst_96 = arith.constant dense<0.000000e+00> : vector<8x34xf32>
    %236 = tpu.matmul %234, %1, %cst_96 {dimension_numbers = #tpu.dot_dimension_numbers<[1], [0], [0], [1], [0, 0, 1, 1], [], []>} : vector<8x16xf32>, vector<16x34xf32>, vector<8x34xf32> -> vector<8x34xf32>
    %cst_97 = arith.constant dense<0.000000e+00> : vector<8x34xf32>
    %237 = tpu.matmul %235, %1, %cst_97 {dimension_numbers = #tpu.dot_dimension_numbers<[1], [0], [0], [1], [0, 0, 1, 1], [], []>} : vector<8x16xf32>, vector<16x34xf32>, vector<8x34xf32> -> vector<8x34xf32>
    %238 = arith.addf %236, %237 : vector<8x34xf32>
    %239 = vector.extract_strided_slice %238 {offsets = [0, 0], sizes = [8, 32], strides = [1, 1]} : vector<8x34xf32> to vector<8x32xf32>
    %c3_98 = arith.constant 3 : index
    %c0_99 = arith.constant 0 : index
    %240 = memref.load %arg4[%c3_98, %c0_99] : memref<16x3xf32, #tpu.memory_space<smem>>
    %241 = vector.broadcast %240 : f32 to vector<8x32xf32>
    %242 = arith.mulf %241, %239 : vector<8x32xf32>
    %243 = arith.addf %204, %242 : vector<8x32xf32>
    %c7 = arith.constant 7 : index
    %c0_100 = arith.constant 0 : index
    %244 = memref.load %arg4[%c7, %c0_100] : memref<16x3xf32, #tpu.memory_space<smem>>
    %245 = vector.broadcast %244 : f32 to vector<8x32xf32>
    %246 = arith.mulf %245, %239 : vector<8x32xf32>
    %247 = arith.addf %208, %246 : vector<8x32xf32>
    %c11 = arith.constant 11 : index
    %c0_101 = arith.constant 0 : index
    %248 = memref.load %arg4[%c11, %c0_101] : memref<16x3xf32, #tpu.memory_space<smem>>
    %249 = vector.broadcast %248 : f32 to vector<8x32xf32>
    %250 = arith.mulf %249, %239 : vector<8x32xf32>
    %251 = arith.addf %212, %250 : vector<8x32xf32>
    %c15 = arith.constant 15 : index
    %c0_102 = arith.constant 0 : index
    %252 = memref.load %arg4[%c15, %c0_102] : memref<16x3xf32, #tpu.memory_space<smem>>
    %253 = vector.broadcast %252 : f32 to vector<8x32xf32>
    %254 = arith.mulf %253, %239 : vector<8x32xf32>
    %255 = arith.addf %216, %254 : vector<8x32xf32>
    %256 = vector.extract_strided_slice %238 {offsets = [0, 1], sizes = [8, 32], strides = [1, 1]} : vector<8x34xf32> to vector<8x32xf32>
    %c3_103 = arith.constant 3 : index
    %c1_104 = arith.constant 1 : index
    %257 = memref.load %arg4[%c3_103, %c1_104] : memref<16x3xf32, #tpu.memory_space<smem>>
    %258 = vector.broadcast %257 : f32 to vector<8x32xf32>
    %259 = arith.mulf %258, %256 : vector<8x32xf32>
    %260 = arith.addf %243, %259 : vector<8x32xf32>
    %c7_105 = arith.constant 7 : index
    %c1_106 = arith.constant 1 : index
    %261 = memref.load %arg4[%c7_105, %c1_106] : memref<16x3xf32, #tpu.memory_space<smem>>
    %262 = vector.broadcast %261 : f32 to vector<8x32xf32>
    %263 = arith.mulf %262, %256 : vector<8x32xf32>
    %264 = arith.addf %247, %263 : vector<8x32xf32>
    %c11_107 = arith.constant 11 : index
    %c1_108 = arith.constant 1 : index
    %265 = memref.load %arg4[%c11_107, %c1_108] : memref<16x3xf32, #tpu.memory_space<smem>>
    %266 = vector.broadcast %265 : f32 to vector<8x32xf32>
    %267 = arith.mulf %266, %256 : vector<8x32xf32>
    %268 = arith.addf %251, %267 : vector<8x32xf32>
    %c15_109 = arith.constant 15 : index
    %c1_110 = arith.constant 1 : index
    %269 = memref.load %arg4[%c15_109, %c1_110] : memref<16x3xf32, #tpu.memory_space<smem>>
    %270 = vector.broadcast %269 : f32 to vector<8x32xf32>
    %271 = arith.mulf %270, %256 : vector<8x32xf32>
    %272 = arith.addf %255, %271 : vector<8x32xf32>
    %273 = vector.extract_strided_slice %238 {offsets = [0, 2], sizes = [8, 32], strides = [1, 1]} : vector<8x34xf32> to vector<8x32xf32>
    %c3_111 = arith.constant 3 : index
    %c2_112 = arith.constant 2 : index
    %274 = memref.load %arg4[%c3_111, %c2_112] : memref<16x3xf32, #tpu.memory_space<smem>>
    %275 = vector.broadcast %274 : f32 to vector<8x32xf32>
    %276 = arith.mulf %275, %273 : vector<8x32xf32>
    %277 = arith.addf %260, %276 : vector<8x32xf32>
    %c7_113 = arith.constant 7 : index
    %c2_114 = arith.constant 2 : index
    %278 = memref.load %arg4[%c7_113, %c2_114] : memref<16x3xf32, #tpu.memory_space<smem>>
    %279 = vector.broadcast %278 : f32 to vector<8x32xf32>
    %280 = arith.mulf %279, %273 : vector<8x32xf32>
    %281 = arith.addf %264, %280 : vector<8x32xf32>
    %c11_115 = arith.constant 11 : index
    %c2_116 = arith.constant 2 : index
    %282 = memref.load %arg4[%c11_115, %c2_116] : memref<16x3xf32, #tpu.memory_space<smem>>
    %283 = vector.broadcast %282 : f32 to vector<8x32xf32>
    %284 = arith.mulf %283, %273 : vector<8x32xf32>
    %285 = arith.addf %268, %284 : vector<8x32xf32>
    %c15_117 = arith.constant 15 : index
    %c2_118 = arith.constant 2 : index
    %286 = memref.load %arg4[%c15_117, %c2_118] : memref<16x3xf32, #tpu.memory_space<smem>>
    %287 = vector.broadcast %286 : f32 to vector<8x32xf32>
    %288 = arith.mulf %287, %273 : vector<8x32xf32>
    %289 = arith.addf %272, %288 : vector<8x32xf32>
    %c0_119 = arith.constant 0 : index
    %c0_120 = arith.constant 0 : index
    %c0_121 = arith.constant 0 : index
    %290 = vector.load %arg5[%c0_119, %c0_120, %c0_121] : memref<8x4x32xf32, #tpu.memory_space<vmem>>, vector<8x1x32xf32>
    %291 = vector.shape_cast %290 : vector<8x1x32xf32> to vector<8x32xf32>
    %292 = vector.shape_cast %277 : vector<8x32xf32> to vector<8x1x32xf32>
    tpu.vector_store %arg5[%c0_119, %c0_120, %c0_121], %292 {strides = array<i32>} : memref<8x4x32xf32, #tpu.memory_space<vmem>>, vector<8x1x32xf32>,
    %c0_122 = arith.constant 0 : index
    %c1_123 = arith.constant 1 : index
    %c0_124 = arith.constant 0 : index
    %293 = vector.load %arg5[%c0_122, %c1_123, %c0_124] : memref<8x4x32xf32, #tpu.memory_space<vmem>>, vector<8x1x32xf32>
    %294 = vector.shape_cast %293 : vector<8x1x32xf32> to vector<8x32xf32>
    %295 = vector.shape_cast %281 : vector<8x32xf32> to vector<8x1x32xf32>
    tpu.vector_store %arg5[%c0_122, %c1_123, %c0_124], %295 {strides = array<i32>} : memref<8x4x32xf32, #tpu.memory_space<vmem>>, vector<8x1x32xf32>,
    %c0_125 = arith.constant 0 : index
    %c2_126 = arith.constant 2 : index
    %c0_127 = arith.constant 0 : index
    %296 = vector.load %arg5[%c0_125, %c2_126, %c0_127] : memref<8x4x32xf32, #tpu.memory_space<vmem>>, vector<8x1x32xf32>
    %297 = vector.shape_cast %296 : vector<8x1x32xf32> to vector<8x32xf32>
    %298 = vector.shape_cast %285 : vector<8x32xf32> to vector<8x1x32xf32>
    tpu.vector_store %arg5[%c0_125, %c2_126, %c0_127], %298 {strides = array<i32>} : memref<8x4x32xf32, #tpu.memory_space<vmem>>, vector<8x1x32xf32>,
    %c0_128 = arith.constant 0 : index
    %c3_129 = arith.constant 3 : index
    %c0_130 = arith.constant 0 : index
    %299 = vector.load %arg5[%c0_128, %c3_129, %c0_130] : memref<8x4x32xf32, #tpu.memory_space<vmem>>, vector<8x1x32xf32>
    %300 = vector.shape_cast %299 : vector<8x1x32xf32> to vector<8x32xf32>
    %301 = vector.shape_cast %289 : vector<8x32xf32> to vector<8x1x32xf32>
    tpu.vector_store %arg5[%c0_128, %c3_129, %c0_130], %301 {strides = array<i32>} : memref<8x4x32xf32, #tpu.memory_space<vmem>>, vector<8x1x32xf32>,
    return
  }
  func.func @transform_0(%arg0: i32) -> (i32, i32) {
    %c0_i32 = arith.constant 0 : i32
    %c0_i32_0 = arith.constant 0 : i32
    return %arg0, %c0_i32 : i32, i32
  }
  func.func @transform_1(%arg0: i32) -> (i32, i32) {
    %c0_i32 = arith.constant 0 : i32
    %c0_i32_0 = arith.constant 0 : i32
    %c0_i32_1 = arith.constant 0 : i32
    return %c0_i32, %c0_i32_0 : i32, i32
  }
  func.func @transform_2(%arg0: i32) -> (i32, i32) {
    %c0_i32 = arith.constant 0 : i32
    %c0_i32_0 = arith.constant 0 : i32
    %c0_i32_1 = arith.constant 0 : i32
    return %c0_i32, %c0_i32_0 : i32, i32
  }
  func.func @transform_3(%arg0: i32) -> (i32, i32) {
    %c0_i32 = arith.constant 0 : i32
    %c0_i32_0 = arith.constant 0 : i32
    %c0_i32_1 = arith.constant 0 : i32
    return %c0_i32, %c0_i32_0 : i32, i32
  }
  func.func @transform_4(%arg0: i32) -> (i32, i32, i32) {
    %c0_i32 = arith.constant 0 : i32
    %c0_i32_0 = arith.constant 0 : i32
    %c0_i32_1 = arith.constant 0 : i32
    return %arg0, %c0_i32, %c0_i32_0 : i32, i32, i32
  }
}

</mosaic_0001>

<bundles_post_ra>
// kernel: decoder_forward.1
= control target key start
LH: loop header
LB: loop body
LE: loop exit
PB: predicated region body
PF: predicated region fallthrough
CT: control target
= control target key end

     0   :  { %9 = vsyncpa [#allocation3], 0  ;;  %s1131_s0 = inlined_call_operand.vmem [shape: f32[8,18], index: 0, kind: input, shape index: {}]   ;;  %s1132_s1 = inlined_call_operand.vmem [shape: f32[16,34], index: 1, kind: input, shape index: {}]   ;;  %s1133_s2 = inlined_call_operand.vmem [shape: f32[4,3], index: 2, kind: input, shape index: {}]   ;;  %s1134_s3 = inlined_call_operand.vmem [shape: f32[16,3], index: 3, kind: input, shape index: {}]   ;;  %s1135_s4 = inlined_call_operand.vmem [shape: f32[8,4,32], index: 4, kind: output, shape index: {}]  }
   0x1   :  { %s20_s17 = sshll.u32 %s1133_s2, 4  ;;  %s21_s17 = int_to_ptr.vmem [resolvable:$true] %s20_s17 }
   0x2   :  { %10 = vsyncpa [#allocation5], 0  ;;  %s28_s20 = sshll.u32 %s1134_s3, 4  ;;  %s839_s21 = smov [#allocation2]   ;;  %s29_s20 = int_to_ptr.vmem [resolvable:$true] %s28_s20 }
   0x3   :  { %23 = dma.vmem_to_smem %s21_s17, 64, %s839_s21, [#allocation3]  }
   0x4   :  { %s840_s22 = smov [#allocation4]   ;;  %s841_s23 = smov 128  }
   0x5   :  { %s842_s24 = smov 8  }
   0x6   :  { %34 = dma.vmem_to_smem %s29_s20, 256, %s840_s22, [#allocation5], %s841_s23, %s841_s23, %s842_s24  }
   0x7   :  { %835 = dma.done.wait [#allocation3], 64  }
   0x8   :  { %836 = vsyncadd [#allocation3], 4294967232 }
   0x9   :  { %837 = dma.done.wait [#allocation5], 256  }
   0xa   :  { %838 = vsyncadd [#allocation5], 4294967040 }
   0xb   :  { %43 = sfence }
   0xc   :  { %s739_s25 = sld [smem:[#allocation2 + $0x1]]  ;;  %v879_v0 = vld [vmem:[%s1131_s0] sm:$0xff]  ;;  %s843_s5 = smov 127   ;;  %v46_v17 = vld [vmem:[%s1132_s1 + $0x8] sm:$0xff]  ;;  %vm70_vm0 = vcmask 130048   ;;  %vm655_vm1 = vcmask 253952  }
   0xd   :  { %s740_s2 = sld [smem:[#allocation2 + $0x2]]  ;;  %s844_s6 = smov 126   ;;  %111 = vmatpush.msra.mxu1 %v46_v17  ;;  %88 = vmatpush.msra.mxu0 %v46_v17  ;;  %v45_v18 = vld [vmem:[%s1132_s1] sm:$0xff] }
   0xe   :  { %s755_s26 = sld [smem:[#allocation2 + $0x81]]  ;;  %233 = vmatpush.msra.mxu2 %v46_v17  ;;  %256 = vmatpush.msra.mxu3 %v46_v17 }
   0xf   :  { %s756_s27 = sld [smem:[#allocation2 + $0x82]]  ;;  %112 = vmatpush.msra.mxu1 %v45_v18  ;;  %89 = vmatpush.msra.mxu0 %v45_v18 }
  0x10   :  { %s772_s3 = sld [smem:[#allocation2 + $0x101]]  ;;  %234 = vmatpush.msra.mxu2 %v45_v18  ;;  %257 = vmatpush.msra.mxu3 %v45_v18 }
  0x11   :  { %s789_s30 = sld [smem:[#allocation2 + $0x181]]  ;;  %382 = vmatpush.msrb.mxu0 %v46_v17  ;;  %405 = vmatpush.msrb.mxu1 %v46_v17 }
  0x12   :  { %v51_v1 = vstv %s739_s25  ;;  %s773_s7 = sld [smem:[#allocation2 + $0x102]]  ;;  %531 = vmatpush.msrb.mxu2 %v46_v17  ;;  %554 = vmatpush.msrb.mxu3 %v46_v17 }
  0x13   :  { %v52_v2 = vmul.f32 %v51_v1, %v879_v0  ;;  %v59_v3 = vstv %s740_s2  ;;  %s790_s8 = sld [smem:[#allocation2 + $0x182]]  ;;  %383 = vmatpush.msrb.mxu0 %v45_v18  ;;  %406 = vmatpush.msrb.mxu1 %v45_v18 }
  0x14   :  { %v60_v4 = vmul.f32 %v59_v3, %v879_v0  ;;  %v197_v5 = vstv %s755_s26  ;;  %532 = vmatpush.msrb.mxu2 %v45_v18  ;;  %555 = vmatpush.msrb.mxu3 %v45_v18  ;;  %s47_s12 = sld [smem:[#allocation2]] }
  0x15   :  { %54 = vrot.lane.b32.xlu0 %v52_v2, %s843_s5  ;;  %v205_v6 = vstv %s756_s27  ;;  %v198_v8 = vmul.f32 %v197_v5, %v879_v0  ;;  %s754_s13 = sld [smem:[#allocation2 + $0x80]] }
  0x16   :  { %62 = vrot.lane.b32.xlu1 %v60_v4, %s844_s6  ;;  %v346_v7 = vstv %s772_s3  ;;  %v206_v10 = vmul.f32 %v205_v6, %v879_v0  ;;  %s771_s1 = sld [smem:[#allocation2 + $0x100]] }
  0x17   :  { %v347_v9 = vmul.f32 %v346_v7, %v879_v0  ;;  %v495_v11 = vstv %s789_s30  ;;  %s788_s14 = sld [smem:[#allocation2 + $0x180]] }
  0x18   :  { %v354_v12 = vstv %s773_s7  ;;  %v496_v14 = vmul.f32 %v495_v11, %v879_v0  ;;  %s748_s15 = sld [smem:[#allocation4 + $0x401]] }
  0x19   :  { %349 = vrot.lane.b32.xlu2 %v347_v9, %s843_s5  ;;  %v503_v13 = vstv %s790_s8  ;;  %v355_v15 = vmul.f32 %v354_v12, %v879_v0  ;;  %s747_s16 = sld [smem:[#allocation4 + $0x201]] }
  0x1a   :  { %v504_v16 = vmul.f32 %v503_v13, %v879_v0  ;;  %v48_v19 = vstv %s47_s12  ;;  %s746_s17 = sld [smem:[#allocation4 + $0x1]] }
  0x1b   :  { %v49_v20 = vmul.f32 %v48_v19, %v879_v0  ;;  %v194_v24 = vstv %s754_s13  ;;  %s751_s18 = sld [smem:[#allocation4 + $0x202]] }
  0x1c   :  { %v195_v28 = vmul.f32 %v194_v24, %v879_v0  ;;  %v343_v29 = vstv %s771_s1  ;;  %s750_s19 = sld [smem:[#allocation4 + $0x2]] }
  0x1d   :  { %200 = vrot.lane.b32.xlu0 %v198_v8, %s843_s5  ;;  %v492_v31 = vstv %s788_s14  ;;  %v344_v36 = vmul.f32 %v343_v29, %v879_v0  ;;  %s749_s20 = sld [smem:[#allocation4 + $0x601]] }
  0x1e   :  { %208 = vrot.lane.b32.xlu1 %v206_v10, %s844_s6  ;;  %v493_v37 = vmul.f32 %v492_v31, %v879_v0  ;;  %v146_v61 = vstv %s748_s15  ;;  %s763_s21 = sld [smem:[#allocation4 + $0x81]] }
  0x1f   :  { %v138_v62 = vstv %s747_s16  ;;  %s753_s22 = sld [smem:[#allocation4 + $0x602]] }
  0x20   :  { %v130_v63 = vstv %s746_s17  ;;  %s752_s23 = sld [smem:[#allocation4 + $0x402]] }
  0x21   :  { %498 = vrot.lane.b32.xlu2 %v496_v14, %s843_s5  ;;  %v170_v4 = vstv %s751_s18  ;;  %s766_s24 = sld [smem:[#allocation4 + $0x681]] }
  0x22   :  { %v162_v5 = vstv %s750_s19  ;;  %s765_s25 = sld [smem:[#allocation4 + $0x481]] }
  0x23   :  { %v154_v6 = vstv %s749_s20  ;;  %s764_s2 = sld [smem:[#allocation4 + $0x281]] }
  0x24   :  { %v279_v12 = vstv %s763_s21  ;;  %s769_s26 = sld [smem:[#allocation4 + $0x482]] }
  0x25   :  { %357 = vrot.lane.b32.xlu0 %v355_v15, %s844_s6  ;;  %v186_v14 = vstv %s753_s22  ;;  %s768_s27 = sld [smem:[#allocation4 + $0x282]] }
  0x26   :  { %506 = vrot.lane.b32.xlu1 %v504_v16, %s844_s6  ;;  %v178_v16 = vstv %s752_s23  ;;  %s767_s28 = sld [smem:[#allocation4 + $0x82]] }
  0x27   :  { %v303_v19 = vstv %s766_s24  ;;  %s781_s29 = sld [smem:[#allocation4 + $0x301]] }
  0x28   :  { %s780_s3 = sld [smem:[#allocation4 + $0x101]] }
  0x29   :  { %s770_s30 = sld [smem:[#allocation4 + $0x682]] }
  0x2a   :  { %s784_s7 = sld [smem:[#allocation4 + $0x102]] }
  0x2b   :  { %s783_s8 = sld [smem:[#allocation4 + $0x701]] }
  0x2c   :  { %s782_s0 = sld [smem:[#allocation4 + $0x501]] }
  0x2d   :  { %s787_s9 = sld [smem:[#allocation4 + $0x702]] }
  0x2e   :  { %s786_s10 = sld [smem:[#allocation4 + $0x502]] }
  0x2f   :  { %s785_s11 = sld [smem:[#allocation4 + $0x302]] }
  0x30   :  { %s799_s12 = sld [smem:[#allocation4 + $0x581]] }
  0x31   :  { %s798_s13 = sld [smem:[#allocation4 + $0x381]] }
  0x32   :  { %s797_s1 = sld [smem:[#allocation4 + $0x181]] }
  0x33   :  { %s802_s14 = sld [smem:[#allocation4 + $0x382]] }
  0x34   :  { %s801_s15 = sld [smem:[#allocation4 + $0x182]] }
  0x35   :  { %s800_s16 = sld [smem:[#allocation4 + $0x781]] }
  0x36   :  { %s804_s17 = sld [smem:[#allocation4 + $0x782]] }
  0x37   :  { %s803_s18 = sld [smem:[#allocation4 + $0x582]] }
  0x38   :  { %s117_s19 = sld [smem:[#allocation4]] }
  0x39   :  { %s745_s20 = sld [smem:[#allocation4 + $0x600]] }
  0x3a   :  { %s761_s21 = sld [smem:[#allocation4 + $0x480]] }
  0x3b   :  { %s743_s22 = sld [smem:[#allocation4 + $0x200]] }
  0x3c   :  { %s760_s23 = sld [smem:[#allocation4 + $0x280]] }
  0x3d   :  { %s759_s24 = sld [smem:[#allocation4 + $0x80]] }
  0x73   :  { %v350_v26 = vpop.permute.xlu2 %349 }
  0x74   :  { %v352_v42 = vadd.f32 %v350_v26, %v344_v36  ;;  %v319_v26 = vstv %s768_s27  ;;  %v335_v36 = vstv %s770_s30  ;;  %s777_s27 = sld [smem:[#allocation4 + $0x300]] }
  0x75   :  { %s795_s30 = sld [smem:[#allocation4 + $0x580]] }
  0x7b   :  { %v499_v40 = vpop.permute.xlu2 %498 }
  0x7c   :  { %v501_v43 = vadd.f32 %v499_v40, %v493_v37  ;;  %v460_v40 = vstv %s784_s7 }
  0x87   :  { %v55_v21 = vpop.permute.xlu0 %54 }
  0x88   :  { %v57_v22 = vadd.f32 %v55_v21, %v49_v20  ;;  %v63_v23 = vpop.permute.xlu1 %62  ;;  %v295_v20 = vstv %s765_s25  ;;  %v287_v21 = vstv %s764_s2  ;;  %s776_s25 = sld [smem:[#allocation4 + $0x100]] }
  0x89   :  { %s779_s2 = sld [smem:[#allocation4 + $0x700]] }
  0x8a   :  { %v65_v25 = vadd.f32 %v63_v23, %v57_v22 }
  0x8c   :  { %v66_v27 = vmax.f32 %v65_v25, 0.0  ;;  %v327_v25 = vstv %s769_s26  ;;  %s778_s26 = sld [smem:[#allocation4 + $0x500]] }
  0x8e   :  { %v67_v30 = vpack.c.bf16 %v66_v27, %v66_v27 }
  0x8f   :  { %v201_v32 = vpop.permute.xlu0 %200 }
  0x90   :  { %v68_v33 = vunpack.c.l.bf16 %v67_v30  ;;  %v203_v34 = vadd.f32 %v201_v32, %v195_v28  ;;  %v209_v35 = vpop.permute.xlu1 %208 }
  0x92   :  { %v69_v38 = vsub.f32 %v66_v27, %v68_v33  ;;  %742 = vmatmul.msk.f32.vlgmr.msra.gmra.mxu1 %vm70_vm0, %v68_v33  ;;  %v211_v39 = vadd.f32 %v209_v35, %v203_v34  ;;  %v311_v27 = vstv %s767_s28  ;;  %v436_v34 = vstv %s781_s29  ;;  %s794_s28 = sld [smem:[#allocation4 + $0x380]] }
  0x93   :  { %v428_v35 = vstv %s780_s3  ;;  %s793_s29 = sld [smem:[#allocation4 + $0x180]] }
  0x94   :  { %v212_v41 = vmax.f32 %v211_v39, 0.0  ;;  %741 = vmatmul.msk.f32.vlgmr.msra.gmra.mxu0 %vm70_vm0, %v69_v38  ;;  %s796_s3 = sld [smem:[#allocation4 + $0x780]] }
  0x96   :  { %v213_v44 = vpack.c.bf16 %v212_v41, %v212_v41 }
  0x97   :  { %v358_v45 = vpop.permute.xlu0 %357 }
  0x98   :  { %v214_v46 = vunpack.c.l.bf16 %v213_v44  ;;  %v360_v47 = vadd.f32 %v358_v45, %v352_v42  ;;  %v507_v48 = vpop.permute.xlu1 %506  ;;  %v444_v42 = vstv %s782_s0 }
  0x99   :  { %v509_v49 = vadd.f32 %v507_v48, %v501_v43  ;;  %v468_v48 = vstv %s785_s11 }
  0x9a   :  { %v215_v50 = vsub.f32 %v212_v41, %v214_v46  ;;  %758 = vmatmul.msk.f32.vlgmr.msra.gmra.mxu3 %vm70_vm0, %v214_v46  ;;  %v361_v51 = vmax.f32 %v360_v47, 0.0  ;;  %v452_v41 = vstv %s783_s8  ;;  %v484_v46 = vstv %s787_s9 }
  0x9b   :  { %v510_v52 = vmax.f32 %v509_v49, 0.0  ;;  %v476_v47 = vstv %s786_s10 }
  0x9c   :  { %757 = vmatmul.msk.f32.vlgmr.msra.gmra.mxu2 %vm70_vm0, %v215_v50  ;;  %v362_v53 = vpack.c.bf16 %v361_v51, %v361_v51 }
  0x9d   :  { %v511_v54 = vpack.c.bf16 %v510_v52, %v510_v52 }
  0x9e   :  { %v363_v55 = vunpack.c.l.bf16 %v362_v53 }
  0x9f   :  { %v512_v56 = vunpack.c.l.bf16 %v511_v54 }
  0xa0   :  { %v364_v57 = vsub.f32 %v361_v51, %v363_v55  ;;  %775 = vmatmul.msk.f32.vlgmr.msrb.gmra.mxu1 %vm70_vm0, %v363_v55  ;;  %v593_v55 = vstv %s799_s12 }
  0xa1   :  { %v513_v58 = vsub.f32 %v510_v52, %v512_v56 }
  0xa2   :  { %774 = vmatmul.msk.f32.vlgmr.msrb.gmra.mxu0 %vm70_vm0, %v364_v57  ;;  %792 = vmatmul.msk.f32.vlgmr.msrb.gmra.mxu3 %vm70_vm0, %v512_v56  ;;  %v585_v56 = vstv %s798_s13  ;;  %v577_v57 = vstv %s797_s1 }
  0xa4   :  { %791 = vmatmul.msk.f32.vlgmr.msrb.gmra.mxu2 %vm70_vm0, %v513_v58 }
 0x10f   :  { %v114_v59 = vpop.f32.mrf.mxu1 }
 0x111   :  { %v91_v60 = vpop.f32.mrf.mxu0 }
 0x112   :  { %v915_v0 = vadd.f32 %v114_v59, %v91_v60 }
 0x114   :  { %v147_v1 = vmul.f32 %v146_v61, %v915_v0  ;;  %v139_v2 = vmul.f32 %v138_v62, %v915_v0  ;;  %v131_v3 = vmul.f32 %v130_v63, %v915_v0  ;;  %v171_v7 = vmul.f32 %v170_v4, %v915_v0 }
 0x115   :  { %v163_v8 = vmul.f32 %v162_v5, %v915_v0  ;;  %v155_v9 = vmul.f32 %v154_v6, %v915_v0  ;;  %v187_v17 = vmul.f32 %v186_v14, %v915_v0  ;;  %v179_v18 = vmul.f32 %v178_v16, %v915_v0 }
 0x116   :  { %149 = vrot.lane.b32.xlu1 %v147_v1, %s843_s5  ;;  %141 = vrot.lane.b32.xlu0 %v139_v2, %s843_s5  ;;  %v617_v61 = vstv %s802_s14  ;;  %v609_v62 = vstv %s801_s15 }
 0x117   :  { %133 = vrot.lane.b32.xlu2 %v131_v3, %s843_s5  ;;  %v601_v63 = vstv %s800_s16  ;;  %v633_v4 = vstv %s804_s17  ;;  %v625_v5 = vstv %s803_s18 }
 0x11d   :  { %v259_v10 = vpop.f32.mrf.mxu3  ;;  %v408_v31 = vpop.f32.mrf.mxu1 }
 0x11e   :  { %173 = vrot.lane.b32.xlu1 %v171_v7, %s844_s6  ;;  %165 = vrot.lane.b32.xlu0 %v163_v8, %s844_s6  ;;  %v118_v8 = vstv %s117_s19 }
 0x11f   :  { %157 = vrot.lane.b32.xlu2 %v155_v9, %s843_s5  ;;  %v236_v11 = vpop.f32.mrf.mxu2  ;;  %v385_v30 = vpop.f32.mrf.mxu0  ;;  %v119_v9 = vmul.f32 %v118_v8, %v915_v0 }
 0x120   :  { %v929_v13 = vadd.f32 %v259_v10, %v236_v11  ;;  %v949_v33 = vadd.f32 %v408_v31, %v385_v30  ;;  %v267_v30 = vstv %s760_s23  ;;  %v263_v31 = vstv %s759_s24 }
 0x122   :  { %v280_v15 = vmul.f32 %v279_v12, %v929_v13  ;;  %v304_v22 = vmul.f32 %v303_v19, %v929_v13  ;;  %v296_v23 = vmul.f32 %v295_v20, %v929_v13  ;;  %v288_v24 = vmul.f32 %v287_v21, %v929_v13 }
 0x123   :  { %v328_v28 = vmul.f32 %v327_v25, %v929_v13  ;;  %v320_v29 = vmul.f32 %v319_v26, %v929_v13  ;;  %v312_v32 = vmul.f32 %v311_v27, %v929_v13  ;;  %v437_v37 = vmul.f32 %v436_v34, %v949_v33 }
 0x124   :  { %v429_v38 = vmul.f32 %v428_v35, %v949_v33  ;;  %v336_v39 = vmul.f32 %v335_v36, %v929_v13  ;;  %v461_v43 = vmul.f32 %v460_v40, %v949_v33  ;;  %v453_v44 = vmul.f32 %v452_v41, %v949_v33 }
 0x125   :  { %v445_v45 = vmul.f32 %v444_v42, %v949_v33  ;;  %v485_v49 = vmul.f32 %v484_v46, %v949_v33  ;;  %v477_v50 = vmul.f32 %v476_v47, %v949_v33  ;;  %v557_v52 = vpop.f32.mrf.mxu3  ;;  %v469_v53 = vmul.f32 %v468_v48, %v949_v33 }
 0x126   :  { %282 = vrot.lane.b32.xlu1 %v280_v15, %s843_s5  ;;  %189 = vrot.lane.b32.xlu0 %v187_v17, %s844_s6  ;;  %v127_v12 = vstv %s745_s20  ;;  %v121_v25 = vstv %s743_s22  ;;  %v268_v36 = vmul.f32 %v267_v30, %v929_v13  ;;  %v264_v40 = vmul.f32 %v263_v31, %v929_v13 }
 0x127   :  { %181 = vrot.lane.b32.xlu2 %v179_v18, %s844_s6  ;;  %v534_v51 = vpop.f32.mrf.mxu2  ;;  %v128_v14 = vmul.f32 %v127_v12, %v915_v0 }
 0x128   :  { %v969_v54 = vadd.f32 %v557_v52, %v534_v51 }
 0x12a   :  { %v594_v58 = vmul.f32 %v593_v55, %v969_v54  ;;  %v586_v59 = vmul.f32 %v585_v56, %v969_v54  ;;  %v578_v60 = vmul.f32 %v577_v57, %v969_v54  ;;  %v618_v1 = vmul.f32 %v617_v61, %v969_v54 }
 0x12b   :  { %v610_v2 = vmul.f32 %v609_v62, %v969_v54  ;;  %v602_v3 = vmul.f32 %v601_v63, %v969_v54  ;;  %v634_v6 = vmul.f32 %v633_v4, %v969_v54  ;;  %v626_v7 = vmul.f32 %v625_v5, %v969_v54 }
 0x12c   :  { %v424_v57 = vstv %s779_s2  ;;  %v420_v63 = vstv %s778_s26 }
 0x12d   :  { %v425_v61 = vmul.f32 %v424_v57, %v949_v33  ;;  %v421_v5 = vmul.f32 %v420_v63, %v949_v33 }
 0x12e   :  { %306 = vrot.lane.b32.xlu1 %v304_v22, %s843_s5  ;;  %298 = vrot.lane.b32.xlu0 %v296_v23, %s843_s5  ;;  %v271_v22 = vstv %s761_s21 }
 0x12f   :  { %290 = vrot.lane.b32.xlu2 %v288_v24, %s843_s5  ;;  %v272_v27 = vmul.f32 %v271_v22, %v929_v13 }
 0x136   :  { %330 = vrot.lane.b32.xlu1 %v328_v28, %s844_s6  ;;  %322 = vrot.lane.b32.xlu0 %v320_v29, %s844_s6  ;;  %v122_v28 = vmul.f32 %v121_v25, %v915_v0 }
 0x137   :  { %314 = vrot.lane.b32.xlu2 %v312_v32, %s844_s6 }
 0x13e   :  { %439 = vrot.lane.b32.xlu1 %v437_v37, %s843_s5  ;;  %431 = vrot.lane.b32.xlu0 %v429_v38, %s843_s5 }
 0x13f   :  { %338 = vrot.lane.b32.xlu2 %v336_v39, %s844_s6 }
 0x146   :  { %463 = vrot.lane.b32.xlu1 %v461_v43, %s844_s6  ;;  %455 = vrot.lane.b32.xlu0 %v453_v44, %s843_s5 }
 0x147   :  { %447 = vrot.lane.b32.xlu2 %v445_v45, %s843_s5  ;;  %v412_v45 = vstv %s776_s25 }
 0x148   :  { %v413_v52 = vmul.f32 %v412_v45, %v949_v33 }
 0x14e   :  { %487 = vrot.lane.b32.xlu1 %v485_v49, %s844_s6  ;;  %479 = vrot.lane.b32.xlu0 %v477_v50, %s844_s6 }
 0x14f   :  { %471 = vrot.lane.b32.xlu2 %v469_v53, %s844_s6 }
 0x156   :  { %596 = vrot.lane.b32.xlu1 %v594_v58, %s843_s5  ;;  %588 = vrot.lane.b32.xlu0 %v586_v59, %s843_s5 }
 0x157   :  { %580 = vrot.lane.b32.xlu2 %v578_v60, %s843_s5 }
 0x15e   :  { %620 = vrot.lane.b32.xlu1 %v618_v1, %s844_s6  ;;  %612 = vrot.lane.b32.xlu0 %v610_v2, %s844_s6  ;;  %v416_v1 = vstv %s777_s27 }
 0x15f   :  { %604 = vrot.lane.b32.xlu2 %v602_v3, %s843_s5  ;;  %s744_s5 = sld [smem:[#allocation4 + $0x400]]  ;;  %v417_v8 = vmul.f32 %v416_v1, %v949_v33 }
 0x165   :  { %v124_v18 = vstv %s744_s5 }
 0x166   :  { %636 = vrot.lane.b32.xlu0 %v634_v6, %s844_s6  ;;  %v125_v19 = vmul.f32 %v124_v18, %v915_v0 }
 0x167   :  { %628 = vrot.lane.b32.xlu2 %v626_v7, %s844_s6  ;;  %s762_s6 = sld [smem:[#allocation4 + $0x680]] }
 0x16d   :  { %v275_v43 = vstv %s762_s6 }
 0x16e   :  { %v276_v49 = vmul.f32 %v275_v43, %v929_v13 }
 0x171   :  { %v134_v10 = vpop.permute.xlu2 %133 }
 0x172   :  { %v136_v11 = vadd.f32 %v134_v10, %v119_v9 }
 0x179   :  { %v158_v15 = vpop.permute.xlu2 %157 }
 0x17a   :  { %v160_v16 = vadd.f32 %v158_v15, %v128_v14  ;;  %v565_v15 = vstv %s794_s28 }
 0x17b   :  { %v566_v18 = vmul.f32 %v565_v15, %v969_v54 }
 0x181   :  { %v182_v17 = vpop.permute.xlu2 %181 }
 0x188   :  { %v150_v20 = vpop.permute.xlu1 %149  ;;  %v142_v21 = vpop.permute.xlu0 %141 }
 0x189   :  { %v152_v23 = vadd.f32 %v150_v20, %v125_v19  ;;  %v291_v24 = vpop.permute.xlu2 %290  ;;  %v144_v32 = vadd.f32 %v142_v21, %v122_v28  ;;  %v561_v21 = vstv %s793_s29  ;;  %v569_v28 = vstv %s795_s30 }
 0x18a   :  { %v562_v33 = vmul.f32 %v561_v21, %v969_v54 }
 0x18b   :  { %v184_v26 = vadd.f32 %v182_v17, %v152_v23 }
 0x18d   :  { %v273_v29 = vadd.f32 %v272_v27, %v184_v26  ;;  %v573_v27 = vstv %s796_s3 }
 0x190   :  { %v174_v34 = vpop.permute.xlu1 %173  ;;  %v166_v35 = vpop.permute.xlu0 %165 }
 0x191   :  { %v176_v37 = vadd.f32 %v174_v34, %v144_v32  ;;  %v168_v38 = vadd.f32 %v166_v35, %v136_v11  ;;  %v315_v39 = vpop.permute.xlu2 %314  ;;  %v574_v35 = vmul.f32 %v573_v27, %v969_v54 }
 0x193   :  { %v269_v41 = vadd.f32 %v268_v36, %v176_v37  ;;  %v265_v42 = vadd.f32 %v264_v40, %v168_v38  ;;  %v570_v38 = vmul.f32 %v569_v28, %v969_v54 }
 0x195   :  { %v293_v13 = vadd.f32 %v291_v24, %v269_v41 }
 0x198   :  { %v283_v44 = vpop.permute.xlu1 %282  ;;  %v190_v0 = vpop.permute.xlu0 %189 }
 0x199   :  { %v285_v46 = vadd.f32 %v283_v44, %v265_v42  ;;  %v192_v47 = vadd.f32 %v190_v0, %v160_v16  ;;  %v339_v48 = vpop.permute.xlu2 %338 }
 0x19b   :  { %v317_v50 = vadd.f32 %v315_v39, %v285_v46  ;;  %v277_v51 = vadd.f32 %v276_v49, %v192_v47 }
 0x19d   :  { %v414_v53 = vadd.f32 %v413_v52, %v317_v50 }
 0x1a0   :  { %v307_v55 = vpop.permute.xlu1 %306  ;;  %v299_v56 = vpop.permute.xlu0 %298 }
 0x1a1   :  { %v309_v58 = vadd.f32 %v307_v55, %v277_v51  ;;  %v448_v59 = vpop.permute.xlu2 %447  ;;  %v301_v2 = vadd.f32 %v299_v56, %v273_v29 }
 0x1a3   :  { %v341_v60 = vadd.f32 %v339_v48, %v309_v58 }
 0x1a5   :  { %v426_v62 = vadd.f32 %v425_v61, %v341_v60 }
 0x1a8   :  { %v331_v3 = vpop.permute.xlu1 %330  ;;  %v323_v4 = vpop.permute.xlu0 %322 }
 0x1a9   :  { %v333_v6 = vadd.f32 %v331_v3, %v301_v2  ;;  %v325_v7 = vadd.f32 %v323_v4, %v293_v13  ;;  %v472_v10 = vpop.permute.xlu2 %471 }
 0x1ab   :  { %v422_v9 = vadd.f32 %v421_v5, %v333_v6  ;;  %v418_v11 = vadd.f32 %v417_v8, %v325_v7 }
 0x1ad   :  { %v450_v31 = vadd.f32 %v448_v59, %v422_v9 }
 0x1b0   :  { %v440_v12 = vpop.permute.xlu1 %439  ;;  %v432_v14 = vpop.permute.xlu0 %431 }
 0x1b1   :  { %v442_v16 = vadd.f32 %v440_v12, %v418_v11  ;;  %v581_v19 = vpop.permute.xlu2 %580  ;;  %v434_v22 = vadd.f32 %v432_v14, %v414_v53 }
 0x1b3   :  { %v474_v17 = vadd.f32 %v472_v10, %v442_v16 }
 0x1b5   :  { %v567_v20 = vadd.f32 %v566_v18, %v474_v17 }
 0x1b8   :  { %v464_v23 = vpop.permute.xlu1 %463  ;;  %v456_v24 = vpop.permute.xlu0 %455 }
 0x1b9   :  { %v466_v25 = vadd.f32 %v464_v23, %v434_v22  ;;  %v458_v29 = vadd.f32 %v456_v24, %v426_v62  ;;  %v605_v30 = vpop.permute.xlu2 %604 }
 0x1bb   :  { %v563_v26 = vadd.f32 %v562_v33, %v466_v25 }
 0x1bd   :  { %v583_v59 = vadd.f32 %v581_v19, %v563_v26 }
 0x1c0   :  { %v488_v32 = vpop.permute.xlu1 %487  ;;  %v480_v34 = vpop.permute.xlu0 %479 }
 0x1c1   :  { %v490_v36 = vadd.f32 %v488_v32, %v458_v29  ;;  %v482_v37 = vadd.f32 %v480_v34, %v450_v31  ;;  %v629_v44 = vpop.permute.xlu2 %628 }
 0x1c3   :  { %v575_v39 = vadd.f32 %v574_v35, %v490_v36  ;;  %v571_v40 = vadd.f32 %v570_v38, %v482_v37 }
 0x1c5   :  { %v607_v5 = vadd.f32 %v605_v30, %v575_v39 }
 0x1c8   :  { %v597_v41 = vpop.permute.xlu1 %596  ;;  %v589_v42 = vpop.permute.xlu0 %588 }
 0x1c9   :  { %v599_v43 = vadd.f32 %v597_v41, %v571_v40  ;;  %v591_v54 = vadd.f32 %v589_v42, %v567_v20 }
 0x1cb   :  { %v631_v0 = vadd.f32 %v629_v44, %v599_v43 }
 0x1cd   :  { %v688_v45 = vrot.slane %v631_v0, 1  ;;  %v689_v46 = vrot.slane %v631_v0, 2  ;;  %v690_v47 = vrot.slane %v631_v0, 3  ;;  %702 = vst.msk [vmem:[%s1135_s4 + $0x2] sm:$0x1] %vm655_vm1, %v631_v0  ;;  %v691_v48 = vrot.slane %v631_v0, 4 }
 0x1ce   :  { %v692_v49 = vrot.slane %v631_v0, 5  ;;  %v693_v50 = vrot.slane %v631_v0, 6  ;;  %v694_v52 = vrot.slane %v631_v0, 7 }
 0x1cf   :  { %703 = vst.msk [vmem:[%s1135_s4 + $0x6] sm:$0x1] %vm655_vm1, %v688_v45 }
 0x1d0   :  { %704 = vst.msk [vmem:[%s1135_s4 + $0xa] sm:$0x1] %vm655_vm1, %v689_v46  ;;  %v621_v51 = vpop.permute.xlu1 %620  ;;  %v613_v55 = vpop.permute.xlu0 %612 }
 0x1d1   :  { %705 = vst.msk [vmem:[%s1135_s4 + $0xe] sm:$0x1] %vm655_vm1, %v690_v47  ;;  %v623_v53 = vadd.f32 %v621_v51, %v591_v54  ;;  %v615_v62 = vadd.f32 %v613_v55, %v583_v59 }
 0x1d2   :  { %706 = vst.msk [vmem:[%s1135_s4 + $0x12] sm:$0x1] %vm655_vm1, %v691_v48 }
 0x1d3   :  { %707 = vst.msk [vmem:[%s1135_s4 + $0x16] sm:$0x1] %vm655_vm1, %v692_v49  ;;  %v665_v56 = vrot.slane %v623_v53, 1  ;;  %v666_v57 = vrot.slane %v623_v53, 2  ;;  %v667_v58 = vrot.slane %v623_v53, 3  ;;  %v668_v60 = vrot.slane %v623_v53, 4 }
 0x1d4   :  { %708 = vst.msk [vmem:[%s1135_s4 + $0x1a] sm:$0x1] %vm655_vm1, %v693_v50  ;;  %v669_v61 = vrot.slane %v623_v53, 5  ;;  %v670_v63 = vrot.slane %v623_v53, 6  ;;  %v671_v1 = vrot.slane %v623_v53, 7  ;;  %v641_v2 = vrot.slane %v615_v62, 1 }
 0x1d5   :  { %709 = vst.msk [vmem:[%s1135_s4 + $0x1e] sm:$0x1] %vm655_vm1, %v694_v52  ;;  %v642_v13 = vrot.slane %v615_v62, 2  ;;  %v643_v4 = vrot.slane %v615_v62, 3  ;;  %v644_v6 = vrot.slane %v615_v62, 4  ;;  %v645_v7 = vrot.slane %v615_v62, 5 }
 0x1d6   :  { %679 = vst.msk [vmem:[%s1135_s4 + $0x1] sm:$0x1] %vm655_vm1, %v623_v53  ;;  %v646_v9 = vrot.slane %v615_v62, 6  ;;  %v647_v10 = vrot.slane %v615_v62, 7 }
 0x1d7   :  { %680 = vst.msk [vmem:[%s1135_s4 + $0x5] sm:$0x1] %vm655_vm1, %v665_v56 }
 0x1d8   :  { %681 = vst.msk [vmem:[%s1135_s4 + $0x9] sm:$0x1] %vm655_vm1, %v666_v57  ;;  %v637_v3 = vpop.permute.xlu0 %636 }
 0x1d9   :  { %682 = vst.msk [vmem:[%s1135_s4 + $0xd] sm:$0x1] %vm655_vm1, %v667_v58  ;;  %v639_v8 = vadd.f32 %v637_v3, %v607_v5 }
 0x1da   :  { %683 = vst.msk [vmem:[%s1135_s4 + $0x11] sm:$0x1] %vm655_vm1, %v668_v60 }
 0x1db   :  { %684 = vst.msk [vmem:[%s1135_s4 + $0x15] sm:$0x1] %vm655_vm1, %v669_v61  ;;  %v711_v11 = vrot.slane %v639_v8, 1  ;;  %v712_v12 = vrot.slane %v639_v8, 2  ;;  %v713_v14 = vrot.slane %v639_v8, 3  ;;  %v714_v15 = vrot.slane %v639_v8, 4 }
 0x1dc   :  { %685 = vst.msk [vmem:[%s1135_s4 + $0x19] sm:$0x1] %vm655_vm1, %v670_v63  ;;  %v715_v16 = vrot.slane %v639_v8, 5  ;;  %v716_v17 = vrot.slane %v639_v8, 6  ;;  %v717_v18 = vrot.slane %v639_v8, 7 }
 0x1dd   :  { %686 = vst.msk [vmem:[%s1135_s4 + $0x1d] sm:$0x1] %vm655_vm1, %v671_v1 }
 0x1de   :  { %656 = vst.msk [vmem:[%s1135_s4] sm:$0x1] %vm655_vm1, %v615_v62 }
 0x1df   :  { %657 = vst.msk [vmem:[%s1135_s4 + $0x4] sm:$0x1] %vm655_vm1, %v641_v2 }
 0x1e0   :  { %658 = vst.msk [vmem:[%s1135_s4 + $0x8] sm:$0x1] %vm655_vm1, %v642_v13 }
 0x1e1   :  { %659 = vst.msk [vmem:[%s1135_s4 + $0xc] sm:$0x1] %vm655_vm1, %v643_v4 }
 0x1e2   :  { %660 = vst.msk [vmem:[%s1135_s4 + $0x10] sm:$0x1] %vm655_vm1, %v644_v6 }
 0x1e3   :  { %661 = vst.msk [vmem:[%s1135_s4 + $0x14] sm:$0x1] %vm655_vm1, %v645_v7 }
 0x1e4   :  { %662 = vst.msk [vmem:[%s1135_s4 + $0x18] sm:$0x1] %vm655_vm1, %v646_v9 }
 0x1e5   :  { %663 = vst.msk [vmem:[%s1135_s4 + $0x1c] sm:$0x1] %vm655_vm1, %v647_v10 }
 0x1e6   :  { %725 = vst.msk [vmem:[%s1135_s4 + $0x3] sm:$0x1] %vm655_vm1, %v639_v8 }
 0x1e7   :  { %726 = vst.msk [vmem:[%s1135_s4 + $0x7] sm:$0x1] %vm655_vm1, %v711_v11 }
 0x1e8   :  { %727 = vst.msk [vmem:[%s1135_s4 + $0xb] sm:$0x1] %vm655_vm1, %v712_v12 }
 0x1e9   :  { %728 = vst.msk [vmem:[%s1135_s4 + $0xf] sm:$0x1] %vm655_vm1, %v713_v14 }
 0x1ea   :  { %729 = vst.msk [vmem:[%s1135_s4 + $0x13] sm:$0x1] %vm655_vm1, %v714_v15 }
 0x1eb   :  { %730 = vst.msk [vmem:[%s1135_s4 + $0x17] sm:$0x1] %vm655_vm1, %v715_v16 }
 0x1ec   :  { %731 = vst.msk [vmem:[%s1135_s4 + $0x1b] sm:$0x1] %vm655_vm1, %v716_v17 }
 0x1ed   :  { %732 = vst.msk [vmem:[%s1135_s4 + $0x1f] sm:$0x1] %vm655_vm1, %v717_v18 }
 0x1ee   :  { %737 = vsyncpa [#allocation3], 1 }
 0x1ef   :  { %738 = vsyncpa [#allocation5], 1 }

</bundles_post_ra>
